<compile_context>
chip_gen: v5e
topology: v5e:2x2
jax: 0.10.0
libtpu: 0.0.40
codegen_flags: <defaults>
</compile_context>

<pallas_src>
import jax
import jax.numpy as jnp
import numpy as np
from jax.experimental import pallas as pl
from jax.experimental.pallas import tpu as pltpu

C_IN, C_OUT, H, W = 8, 4, 15, 15
P = H * W                      # 225 spatial positions
CONV_FLAT = C_IN * P           # 1800
FLAT = 5
HIDDEN = 32                    # the 'h' constructor argument of FC4


def _fc4_kernel(conv_ref, flat_ref, wc_ref, wf_ref, b_ref, o_ref):
    # conv: (tile, 1800) f32, flat: (tile, 5) f32,
    # wc: (1800, 32) bf16, wf: (5, 32) bf16, b: (1, 32) f32.
    acc = jnp.dot(conv_ref[...].astype(jnp.bfloat16), wc_ref[...],
                  preferred_element_type=jnp.float32)            # (tile, 32)
    acc = acc + jnp.dot(flat_ref[...].astype(jnp.bfloat16), wf_ref[...],
                        preferred_element_type=jnp.float32)
    o_ref[...] = jnp.maximum(acc + b_ref[...], 0.0)              # ReLU


def prepare_fc4_params(params):
    """Fold the 1x1 conv and both biases into the fc weights. Called ONCE.

    Returns (wc, wf, b):
      wc: (1800, 32) bf16 — acts on conv.reshape(-1) (channel-major, i*225+p)
      wf: (5, 32)    bf16 — acts on `flat`
      b : (1, 32)    f32  — b2 + w2_conv @ b1 (broadcast over batch)
    Standard (K, N) layout -> plain ((1,),(0,)) contraction, no weight transpose.
    """
    w1, b1, w2, b2 = params["w1"], params["b1"], params["w2"], params["b2"]
    w2_conv = w2[:, :C_OUT * P].reshape(HIDDEN, C_OUT, P)         # (h, 4, 225)
    w2_flat = w2[:, C_OUT * P:]                                   # (h, 5)
    # y[h] = sum_{i,p} (sum_c w2[h,c,p] w1[c,i]) conv[i,p] + flat.w2_flat[h]
    #        + (b2[h] + sum_{c,p} w2[h,c,p] b1[c])
    wc = jnp.einsum("hcp,ci->iph", w2_conv, w1).reshape(CONV_FLAT, HIDDEN)
    wf = w2_flat.T                                                # (5, h)
    b = (b2 + jnp.einsum("hcp,c->h", w2_conv, b1)).reshape(1, HIDDEN)
    return wc.astype(jnp.bfloat16), wf.astype(jnp.bfloat16), b.astype(jnp.float32)


def _round_up(x, m):
    return ((x + m - 1) // m) * m


def _pick_tile(B):
    """Sublane-aligned batch tile.

    Large (<=512 rows, ~3.7 MB/step activations, well under default scoped
    VMEM) to amortize per-grid-step overhead, but >= 2 grid steps when B > 8
    so the 'parallel' batch axis keeps both v7x TensorCores busy.
    """
    if B <= 8:
        return 8
    return max(8, min(512, _round_up(pl.cdiv(B, 2), 8)))


def fc4_forward(conv, flat, ents, fused):
    """Single-sample forward, matching FC4.forward. conv: (8,15,15), flat: (5,)."""
    del ents  # unused by FC4.forward
    wc, wf, b = fused
    x = conv.reshape(1, CONV_FLAT)        # free bitcast, no concat copy
    f = flat.reshape(1, FLAT)
    vmem = pl.BlockSpec(memory_space=pltpu.MemorySpace.VMEM)
    return pl.pallas_call(
        _fc4_kernel,
        out_shape=jax.ShapeDtypeStruct((1, HIDDEN), jnp.float32),
        in_specs=[vmem] * 5,
        out_specs=vmem,
    )(x, f, wc, wf, b)                                            # (1, h)


def fc4_forward_batched(conv_b, flat_b, ents, fused, *, tile=None):
    """Batched forward (B samples in one pallas_call)."""
    del ents
    wc, wf, b = fused
    B = conv_b.shape[0]
    conv2d = conv_b.reshape(B, CONV_FLAT)  # free bitcast, no concat copy
    if tile is None:
        tile = _pick_tile(B)
    return pl.pallas_call(
        _fc4_kernel,
        out_shape=jax.ShapeDtypeStruct((B, HIDDEN), jnp.float32),
        grid=(pl.cdiv(B, tile),),
        in_specs=[
            pl.BlockSpec((tile, CONV_FLAT), lambda i: (i, 0)),
            pl.BlockSpec((tile, FLAT), lambda i: (i, 0)),
            pl.BlockSpec((CONV_FLAT, HIDDEN), lambda i: (0, 0)),
            pl.BlockSpec((FLAT, HIDDEN), lambda i: (0, 0)),
            pl.BlockSpec((1, HIDDEN), lambda i: (0, 0)),
        ],
        out_specs=pl.BlockSpec((tile, HIDDEN), lambda i: (i, 0)),
        compiler_params=pltpu.CompilerParams(dimension_semantics=("parallel",)),
    )(conv2d, flat_b, wc, wf, b)                                  # (B, h)


def fc4_reference(conv, flat, params):
    # Pure-JAX f32 reference mirroring the PyTorch forward exactly (unfused).
    x = jnp.einsum("oi,ihw->ohw", params["w1"], conv) + params["b1"][:, None, None]
    v = jnp.concatenate([x.reshape(-1), flat])
    y = v @ params["w2"].T + params["b2"]
    return jnp.maximum(y, 0.0)[None, :]


if __name__ == "__main__":
    key = jax.random.PRNGKey(0)
    k1, k2, k3, k4, k5, k6, k7, k8, k9, k10, k11 = jax.random.split(key, 11)

    # Deterministic synthetic parameters (shapes from the module's __init__).
    params = {
        "w1": jax.random.normal(k1, (C_OUT, C_IN), jnp.float32) * 0.1,   # Conv2d(8,4,1)
        "b1": jax.random.normal(k2, (C_OUT,), jnp.float32) * 0.1,
        "w2": jax.random.normal(k3, (HIDDEN, C_OUT * P + FLAT), jnp.float32) * 0.05,
        "b2": jax.random.normal(k4, (HIDDEN,), jnp.float32) * 0.05,
    }

    # One-time weight fusion (conv + biases folded, transposed, bf16).
    fused = jax.block_until_ready(prepare_fc4_params(params))

    # bf16 weight path -> loosened tolerance vs. f32 reference.
    RTOL, ATOL = 2e-2, 2e-2

    # --- single-sample path (exact FC4.forward API) ---
    conv = jax.random.normal(k5, (C_IN, H, W), jnp.float32)       # (8, 15, 15)
    flat = jax.random.normal(k6, (FLAT,), jnp.float32)            # (5,)
    ents = jax.random.normal(k7, (3, 7), jnp.float32)             # unused by forward

    out = jax.block_until_ready(fc4_forward(conv, flat, ents, fused))
    ref = fc4_reference(conv, flat, params)
    np.testing.assert_allclose(np.asarray(out), np.asarray(ref), rtol=RTOL, atol=ATOL)
    assert out.shape == (1, HIDDEN)

    # --- batched path (throughput variant) ---
    B = 16
    conv_b = jax.random.normal(k8, (B, C_IN, H, W), jnp.float32)
    flat_b = jax.random.normal(k9, (B, FLAT), jnp.float32)
    out_b = jax.block_until_ready(fc4_forward_batched(conv_b, flat_b, ents, fused))
    ref_b = jax.vmap(lambda c, f: fc4_reference(c, f, params)[0])(conv_b, flat_b)
    np.testing.assert_allclose(np.asarray(out_b), np.asarray(ref_b), rtol=RTOL, atol=ATOL)
    assert out_b.shape == (B, HIDDEN)

    # --- ragged batch: B not a multiple of the tile (last block partially valid) ---
    B2 = 20                                    # tile -> 16, grid=2, last block ragged
    conv_r = jax.random.normal(k10, (B2, C_IN, H, W), jnp.float32)
    flat_r = jax.random.normal(k11, (B2, FLAT), jnp.float32)
    out_r = jax.block_until_ready(fc4_forward_batched(conv_r, flat_r, ents, fused))
    ref_r = jax.vmap(lambda c, f: fc4_reference(c, f, params)[0])(conv_r, flat_r)
    np.testing.assert_allclose(np.asarray(out_r), np.asarray(ref_r), rtol=RTOL, atol=ATOL)
    assert out_r.shape == (B2, HIDDEN)

    print("KERNEL_OK")
</pallas_src>

<mosaic_0001>
module attributes {stable_mosaic.version = 11 : i64} {
  func.func @_fc4_kernel(%arg0: memref<1x1800xf32, #tpu.memory_space<vmem>>, %arg1: memref<1x5xf32, #tpu.memory_space<vmem>>, %arg2: memref<1800x32xbf16, #tpu.memory_space<vmem>>, %arg3: memref<5x32xbf16, #tpu.memory_space<vmem>>, %arg4: memref<1x32xf32, #tpu.memory_space<vmem>>, %arg5: memref<1x32xf32, #tpu.memory_space<vmem>>) attributes {dimension_semantics = [], scalar_prefetch = 0 : i64, scratch_operands = 0 : i64, tpu.core_type = #tpu.core_type<tc>} {
    %c0 = arith.constant 0 : index
    %c0_0 = arith.constant 0 : index
    %0 = vector.load %arg0[%c0, %c0_0] : memref<1x1800xf32, #tpu.memory_space<vmem>>, vector<1x1800xf32>
    %1 = arith.truncf %0 : vector<1x1800xf32> to vector<1x1800xbf16>
    %c0_1 = arith.constant 0 : index
    %c0_2 = arith.constant 0 : index
    %2 = vector.load %arg2[%c0_1, %c0_2] : memref<1800x32xbf16, #tpu.memory_space<vmem>>, vector<1800x32xbf16>
    %cst = arith.constant dense<0.000000e+00> : vector<1x32xf32>
    %3 = tpu.matmul %1, %2, %cst {dimension_numbers = #tpu.dot_dimension_numbers<[1], [0], [0], [1], [0, 0, 1, 1], [], []>} : vector<1x1800xbf16>, vector<1800x32xbf16>, vector<1x32xf32> -> vector<1x32xf32>
    %c0_3 = arith.constant 0 : index
    %c0_4 = arith.constant 0 : index
    %4 = vector.load %arg1[%c0_3, %c0_4] : memref<1x5xf32, #tpu.memory_space<vmem>>, vector<1x5xf32>
    %5 = arith.truncf %4 : vector<1x5xf32> to vector<1x5xbf16>
    %c0_5 = arith.constant 0 : index
    %c0_6 = arith.constant 0 : index
    %6 = vector.load %arg3[%c0_5, %c0_6] : memref<5x32xbf16, #tpu.memory_space<vmem>>, vector<5x32xbf16>
    %cst_7 = arith.constant dense<0.000000e+00> : vector<1x32xf32>
    %7 = tpu.matmul %5, %6, %cst_7 {dimension_numbers = #tpu.dot_dimension_numbers<[1], [0], [0], [1], [0, 0, 1, 1], [], []>} : vector<1x5xbf16>, vector<5x32xbf16>, vector<1x32xf32> -> vector<1x32xf32>
    %8 = arith.addf %3, %7 : vector<1x32xf32>
    %c0_8 = arith.constant 0 : index
    %c0_9 = arith.constant 0 : index
    %9 = vector.load %arg4[%c0_8, %c0_9] : memref<1x32xf32, #tpu.memory_space<vmem>>, vector<1x32xf32>
    %10 = arith.addf %8, %9 : vector<1x32xf32>
    %cst_10 = arith.constant 0.000000e+00 : f32
    %11 = vector.broadcast %cst_10 : f32 to vector<1x32xf32>
    %12 = arith.maximumf %10, %11 : vector<1x32xf32>
    %c0_11 = arith.constant 0 : index
    %c0_12 = arith.constant 0 : index
    %13 = vector.load %arg5[%c0_11, %c0_12] : memref<1x32xf32, #tpu.memory_space<vmem>>, vector<1x32xf32>
    tpu.vector_store %arg5[%c0_11, %c0_12], %12 {strides = array<i32>} : memref<1x32xf32, #tpu.memory_space<vmem>>, vector<1x32xf32>,
    return
  }
}

</mosaic_0001>

<bundles_post_ra>
// kernel: tpu_custom_call.1
= control target key start
LH: loop header
LB: loop body
LE: loop exit
PB: predicated region body
PF: predicated region fallthrough
CT: control target
= control target key end

     0   :  { %vm303_vm0 = vcmask 1041408   ;;  %vm304_vm1 = vcmask 1042432   ;;  %v1812_v3 = vmov 65535   ;;  %vm299_vm2 = vcmask 39936   ;;  %s2220_s0 = inlined_call_operand.vmem [shape: f32[1,1800], index: 0, kind: input, shape index: {}]   ;;  %s2221_s1 = inlined_call_operand.vmem [shape: f32[1,5], index: 1, kind: input, shape index: {}]   ;;  %s2222_s2 = inlined_call_operand.vmem [shape: bf16[1800,32], index: 2, kind: input, shape index: {}]   ;;  %s2223_s3 = inlined_call_operand.vmem [shape: bf16[5,32], index: 3, kind: input, shape index: {}]   ;;  %s2224_s4 = inlined_call_operand.vmem [shape: f32[1,32], index: 4, kind: input, shape index: {}]   ;;  %s2225_s5 = inlined_call_operand.hbm [shape: f32[1,32], index: 5, kind: output, shape index: {}]  }
   0x1   :  { %v1679_v0 = vld [vmem:[%s2222_s2 + $0x38] sm:$0xff]  ;;  %v305_v4 = vsel %vm303_vm0, 4294967295, %v1812_v3  ;;  %v1678_v5 = vld [vmem:[%s2222_s2 + $0x30] sm:$0xff]  ;;  %v298_v7 = vld [vmem:[%s2223_s3] sm:$0x7] }
   0x2   :  { %v1687_v1 = vld [vmem:[%s2222_s2 + $0x78] sm:$0xff]  ;;  %1006 = vmatpush.bf16.msra.mxu1 %v1679_v0  ;;  %v1686_v6 = vld [vmem:[%s2222_s2 + $0x70] sm:$0xff]  ;;  %v306_v8 = vsel %vm304_vm1, %v305_v4, 0  ;;  %v1677_v12 = vld [vmem:[%s2222_s2 + $0x28] sm:$0xff] }
   0x3   :  { %v1695_v2 = vld [vmem:[%s2222_s2 + $0xb8] sm:$0xff]  ;;  %1019 = vmatpush.bf16.msra.mxu2 %v1687_v1  ;;  %v1694_v9 = vld [vmem:[%s2222_s2 + $0xb0] sm:$0xff]  ;;  %v308_v10 = vand.u32 %v306_v8, %v298_v7  ;;  %v1685_v13 = vld [vmem:[%s2222_s2 + $0x68] sm:$0xff] }
   0x4   :  { %1032 = vmatpush.bf16.msra.mxu3 %v1695_v2  ;;  %v1703_v11 = vld [vmem:[%s2222_s2 + $0xf8] sm:$0xff]  ;;  %v1693_v14 = vld [vmem:[%s2222_s2 + $0xa8] sm:$0xff]  ;;  %v1702_v15 = vld [vmem:[%s2222_s2 + $0xf0] sm:$0xff] }
   0x5   :  { %317 = vmatpush.bf16.msra.mxu0 %v308_v10  ;;  %v1676_v16 = vld [vmem:[%s2222_s2 + $0x20] sm:$0xff]  ;;  %v1701_v19 = vld [vmem:[%s2222_s2 + $0xe8] sm:$0xff]  ;;  %v1675_v21 = vld [vmem:[%s2222_s2 + $0x18] sm:$0xff] }
   0x6   :  { %1007 = vmatpush.bf16.msra.mxu1 %v1678_v5  ;;  %v1684_v17 = vld [vmem:[%s2222_s2 + $0x60] sm:$0xff]  ;;  %v1683_v22 = vld [vmem:[%s2222_s2 + $0x58] sm:$0xff]  ;;  %v1674_v26 = vld [vmem:[%s2222_s2 + $0x10] sm:$0xff] }
   0x7   :  { %1020 = vmatpush.bf16.msra.mxu2 %v1686_v6  ;;  %v1692_v18 = vld [vmem:[%s2222_s2 + $0xa0] sm:$0xff]  ;;  %v1691_v24 = vld [vmem:[%s2222_s2 + $0x98] sm:$0xff]  ;;  %v1682_v27 = vld [vmem:[%s2222_s2 + $0x50] sm:$0xff] }
   0x8   :  { %1033 = vmatpush.bf16.msra.mxu3 %v1694_v9  ;;  %v296_v20 = vld [vmem:[%s2221_s1] sm:$0x1] }
   0x9   :  { %1045 = vmatpush.bf16.msrb.mxu0 %v1703_v11  ;;  %v297_v23 = vpack.c.bf16 %v296_v20, %v296_v20  ;;  %v1700_v25 = vld [vmem:[%s2222_s2 + $0xe0] sm:$0xff] }
   0xa   :  { %1008 = vmatpush.bf16.msra.mxu1 %v1677_v12 }
   0xb   :  { %1021 = vmatpush.bf16.msra.mxu2 %v1685_v13  ;;  %1222 = vmatmul.msk.bf16.vlgmr.msra.gmra.mxu0 %vm299_vm2, %v297_v23 }
   0xc   :  { %1034 = vmatpush.bf16.msra.mxu3 %v1693_v14 }
   0xd   :  { %1046 = vmatpush.bf16.msrb.mxu0 %v1702_v15 }
   0xe   :  { %1009 = vmatpush.bf16.msra.mxu1 %v1676_v16 }
   0xf   :  { %1022 = vmatpush.bf16.msra.mxu2 %v1684_v17 }
  0x10   :  { %1035 = vmatpush.bf16.msra.mxu3 %v1692_v18 }
  0x11   :  { %1047 = vmatpush.bf16.msrb.mxu0 %v1701_v19 }
  0x12   :  { %1010 = vmatpush.bf16.msra.mxu1 %v1675_v21 }
  0x13   :  { %1023 = vmatpush.bf16.msra.mxu2 %v1683_v22 }
  0x14   :  { %10 = vsyncpa [#allocation3], 0  ;;  %1036 = vmatpush.bf16.msra.mxu3 %v1691_v24  ;;  %v1690_v28 = vld [vmem:[%s2222_s2 + $0x90] sm:$0xff]  ;;  %v1699_v29 = vld [vmem:[%s2222_s2 + $0xd8] sm:$0xff]  ;;  %vm1002_vm3 = vcmask 1043456   ;;  %vm998_vm4 = vcmask 64512  }
  0x15   :  { %1048 = vmatpush.bf16.msrb.mxu0 %v1700_v25  ;;  %v1673_v30 = vld [vmem:[%s2222_s2 + $0x8] sm:$0xff]  ;;  %v1928_v32 = vld [vmem:[%s2220_s0] sm:$0xff]  ;;  %v1698_v34 = vld [vmem:[%s2222_s2 + $0xd0] sm:$0xff]  ;;  %s1813_s10 = smov [#allocation2]   ;;  %s1213_s13 = sshll.u32 %s2225_s5, 4  ;;  %vm1204_vm5 = vcmask 253952   ;;  %s1214_s13 = int_to_ptr.hbm [resolvable:$true] %s1213_s13 }
  0x16   :  { %1011 = vmatpush.bf16.msra.mxu1 %v1674_v26  ;;  %v1681_v31 = vld [vmem:[%s2222_s2 + $0x48] sm:$0xff]  ;;  %v27_v35 = vperm.slane %v1928_v32, 1  ;;  %v1672_v36 = vld [vmem:[%s2222_s2] sm:$0xff]  ;;  %v26_v38 = vperm.slane %v1928_v32, 0  ;;  %v1711_v39 = vld [vmem:[%s2222_s2 + $0x138] sm:$0xff]  ;;  %v28_v43 = vperm.slane %v1928_v32, 2 }
  0x17   :  { %1024 = vmatpush.bf16.msra.mxu2 %v1682_v27  ;;  %v1689_v33 = vld [vmem:[%s2222_s2 + $0x88] sm:$0xff]  ;;  %v1680_v37 = vld [vmem:[%s2222_s2 + $0x40] sm:$0xff]  ;;  %v1719_v40 = vld [vmem:[%s2222_s2 + $0x178] sm:$0xff]  ;;  %v29_v51 = vperm.slane %v1928_v32, 3  ;;  %v31_v11 = vperm.slane %v1928_v32, 5  ;;  %v30_v14 = vperm.slane %v1928_v32, 4 }
  0x18   :  { %1037 = vmatpush.bf16.msra.mxu3 %v1690_v28  ;;  %v1688_v41 = vld [vmem:[%s2222_s2 + $0x80] sm:$0xff]  ;;  %v1697_v42 = vld [vmem:[%s2222_s2 + $0xc8] sm:$0xff]  ;;  %v1727_v44 = vld [vmem:[%s2222_s2 + $0x1b8] sm:$0xff]  ;;  %v57_v45 = vpack.c.bf16 %v27_v35, %v27_v35  ;;  %v56_v46 = vpack.c.bf16 %v26_v38, %v26_v38  ;;  %v58_v50 = vpack.c.bf16 %v28_v43, %v28_v43  ;;  %v32_v19 = vperm.slane %v1928_v32, 6  ;;  %s1211_s11 = sshll.u32 %s1813_s10, 4  ;;  %s1212_s11 = int_to_ptr.vmem [resolvable:$true] %s1211_s11 }
  0x19   :  { %1049 = vmatpush.bf16.msrb.mxu0 %v1699_v29  ;;  %v1710_v47 = vld [vmem:[%s2222_s2 + $0x130] sm:$0xff]  ;;  %v1696_v49 = vld [vmem:[%s2222_s2 + $0xc0] sm:$0xff]  ;;  %v1735_v53 = vld [vmem:[%s2222_s2 + $0x1f8] sm:$0xff]  ;;  %v59_v56 = vpack.c.bf16 %v29_v51, %v29_v51  ;;  %v61_v21 = vpack.c.bf16 %v31_v11, %v31_v11  ;;  %v60_v22 = vpack.c.bf16 %v30_v14, %v30_v14  ;;  %v33_v27 = vperm.slane %v1928_v32, 7 }
  0x1a   :  { %1012 = vmatpush.bf16.msra.mxu1 %v1673_v30  ;;  %v1718_v48 = vld [vmem:[%s2222_s2 + $0x170] sm:$0xff]  ;;  %v1709_v54 = vld [vmem:[%s2222_s2 + $0x128] sm:$0xff]  ;;  %v1708_v59 = vld [vmem:[%s2222_s2 + $0x120] sm:$0xff]  ;;  %v62_v25 = vpack.c.bf16 %v32_v19, %v32_v19 }
  0x1b   :  { %1025 = vmatpush.bf16.msra.mxu2 %v1681_v31  ;;  %v1726_v52 = vld [vmem:[%s2222_s2 + $0x1b0] sm:$0xff]  ;;  %v1717_v55 = vld [vmem:[%s2222_s2 + $0x168] sm:$0xff]  ;;  %v1716_v60 = vld [vmem:[%s2222_s2 + $0x160] sm:$0xff]  ;;  %v63_v32 = vpack.c.bf16 %v33_v27, %v33_v27 }
  0x1c   :  { %1038 = vmatpush.bf16.msra.mxu3 %v1689_v33  ;;  %v1725_v57 = vld [vmem:[%s2222_s2 + $0x1a8] sm:$0xff]  ;;  %v1734_v58 = vld [vmem:[%s2222_s2 + $0x1f0] sm:$0xff]  ;;  %v1724_v61 = vld [vmem:[%s2222_s2 + $0x1a0] sm:$0xff] }
  0x1d   :  { %1050 = vmatpush.bf16.msrb.mxu0 %v1698_v34  ;;  %v1733_v62 = vld [vmem:[%s2222_s2 + $0x1e8] sm:$0xff]  ;;  %v1707_v63 = vld [vmem:[%s2222_s2 + $0x118] sm:$0xff]  ;;  %v1732_v2 = vld [vmem:[%s2222_s2 + $0x1e0] sm:$0xff] }
  0x1e   :  { %1013 = vmatpush.bf16.msra.mxu1 %v1672_v36  ;;  %v1715_v0 = vld [vmem:[%s2222_s2 + $0x158] sm:$0xff]  ;;  %v1706_v3 = vld [vmem:[%s2222_s2 + $0x110] sm:$0xff]  ;;  %v1705_v7 = vld [vmem:[%s2222_s2 + $0x108] sm:$0xff] }
  0x1f   :  { %1026 = vmatpush.bf16.msra.mxu2 %v1680_v37  ;;  %v1723_v1 = vld [vmem:[%s2222_s2 + $0x198] sm:$0xff]  ;;  %v1714_v4 = vld [vmem:[%s2222_s2 + $0x150] sm:$0xff]  ;;  %v1713_v8 = vld [vmem:[%s2222_s2 + $0x148] sm:$0xff] }
  0x20   :  { %1039 = vmatpush.bf16.msra.mxu3 %v1688_v41  ;;  %v1722_v5 = vld [vmem:[%s2222_s2 + $0x190] sm:$0xff]  ;;  %v1731_v6 = vld [vmem:[%s2222_s2 + $0x1d8] sm:$0xff]  ;;  %v1721_v9 = vld [vmem:[%s2222_s2 + $0x188] sm:$0xff] }
  0x21   :  { %1051 = vmatpush.bf16.msrb.mxu0 %v1697_v42  ;;  %1014 = vmatmul.bf16.vlgmr.msra.gmra.mxu1 %v56_v46  ;;  %v1730_v10 = vld [vmem:[%s2222_s2 + $0x1d0] sm:$0xff]  ;;  %v1704_v12 = vld [vmem:[%s2222_s2 + $0x100] sm:$0xff]  ;;  %v1743_v15 = vld [vmem:[%s2222_s2 + $0x238] sm:$0xff] }
  0x22   :  { %1058 = vmatpush.bf16.msrb.mxu1 %v1711_v39  ;;  %1027 = vmatmul.bf16.vlgmr.msra.gmra.mxu2 %v57_v45  ;;  %v1712_v13 = vld [vmem:[%s2222_s2 + $0x140] sm:$0xff]  ;;  %v1751_v16 = vld [vmem:[%s2222_s2 + $0x278] sm:$0xff]  ;;  %v1729_v18 = vld [vmem:[%s2222_s2 + $0x1c8] sm:$0xff] }
  0x23   :  { %1071 = vmatpush.bf16.msrb.mxu2 %v1719_v40  ;;  %1040 = vmatmul.bf16.vlgmr.msra.gmra.mxu3 %v58_v50  ;;  %v1720_v17 = vld [vmem:[%s2222_s2 + $0x180] sm:$0xff]  ;;  %v1759_v20 = vld [vmem:[%s2222_s2 + $0x2b8] sm:$0xff]  ;;  %v1742_v23 = vld [vmem:[%s2222_s2 + $0x230] sm:$0xff] }
  0x24   :  { %1084 = vmatpush.bf16.msrb.mxu3 %v1727_v44  ;;  %v1750_v24 = vld [vmem:[%s2222_s2 + $0x270] sm:$0xff]  ;;  %v1728_v26 = vld [vmem:[%s2222_s2 + $0x1c0] sm:$0xff]  ;;  %v1767_v29 = vld [vmem:[%s2222_s2 + $0x2f8] sm:$0xff] }
  0x25   :  { %1052 = vmatpush.bf16.msrb.mxu0 %v1696_v49  ;;  %v1758_v28 = vld [vmem:[%s2222_s2 + $0x2b0] sm:$0xff]  ;;  %v1741_v30 = vld [vmem:[%s2222_s2 + $0x228] sm:$0xff]  ;;  %v1740_v35 = vld [vmem:[%s2222_s2 + $0x220] sm:$0xff] }
  0x26   :  { %1059 = vmatpush.bf16.msrb.mxu1 %v1710_v47  ;;  %v1749_v31 = vld [vmem:[%s2222_s2 + $0x268] sm:$0xff]  ;;  %v1766_v34 = vld [vmem:[%s2222_s2 + $0x2f0] sm:$0xff]  ;;  %v1748_v36 = vld [vmem:[%s2222_s2 + $0x260] sm:$0xff] }
  0x27   :  { %1072 = vmatpush.bf16.msrb.mxu2 %v1718_v48  ;;  %v1757_v33 = vld [vmem:[%s2222_s2 + $0x2a8] sm:$0xff]  ;;  %v1756_v37 = vld [vmem:[%s2222_s2 + $0x2a0] sm:$0xff]  ;;  %v1739_v39 = vld [vmem:[%s2222_s2 + $0x218] sm:$0xff] }
  0x28   :  { %1085 = vmatpush.bf16.msrb.mxu3 %v1726_v52  ;;  %1053 = vmatmul.bf16.vlgmr.msrb.gmra.mxu0 %v59_v56  ;;  %v1765_v38 = vld [vmem:[%s2222_s2 + $0x2e8] sm:$0xff]  ;;  %v1747_v40 = vld [vmem:[%s2222_s2 + $0x258] sm:$0xff]  ;;  %v1764_v42 = vld [vmem:[%s2222_s2 + $0x2e0] sm:$0xff] }
  0x29   :  { %1097 = vmatpush.bf16.msra.mxu0 %v1735_v53  ;;  %v1755_v41 = vld [vmem:[%s2222_s2 + $0x298] sm:$0xff]  ;;  %v1738_v43 = vld [vmem:[%s2222_s2 + $0x210] sm:$0xff]  ;;  %v295_v47 = vld [vmem:[%s2222_s2 + $0x380] sm:$0xf] }
  0x2a   :  { %1060 = vmatpush.bf16.msrb.mxu1 %v1709_v54  ;;  %v1746_v44 = vld [vmem:[%s2222_s2 + $0x250] sm:$0xff]  ;;  %v1763_v46 = vld [vmem:[%s2222_s2 + $0x2d8] sm:$0xff]  ;;  %v1737_v48 = vld [vmem:[%s2222_s2 + $0x208] sm:$0xff]  ;;  %v772_v51 = vunpack.c.l.b16 %v295_v47 }
  0x2b   :  { %1073 = vmatpush.bf16.msrb.mxu2 %v1717_v55  ;;  %v1754_v45 = vld [vmem:[%s2222_s2 + $0x290] sm:$0xff]  ;;  %v1745_v49 = vld [vmem:[%s2222_s2 + $0x248] sm:$0xff]  ;;  %v1736_v56 = vld [vmem:[%s2222_s2 + $0x200] sm:$0xff] }
  0x2c   :  { %1086 = vmatpush.bf16.msrb.mxu3 %v1725_v57  ;;  %v2136_v50 = vld [vmem:[%s2220_s0 + $0x8] sm:$0x7f]  ;;  %v1762_v53 = vld [vmem:[%s2222_s2 + $0x2d0] sm:$0xff]  ;;  %v1744_v57 = vld [vmem:[%s2222_s2 + $0x240] sm:$0xff] }
  0x2d   :  { %1098 = vmatpush.bf16.msra.mxu0 %v1734_v58  ;;  %v1753_v52 = vld [vmem:[%s2222_s2 + $0x288] sm:$0xff]  ;;  %v34_v54 = vperm.slane %v2136_v50, 0  ;;  %v35_v55 = vperm.slane %v2136_v50, 1  ;;  %v1775_v58 = vld [vmem:[%s2222_s2 + $0x338] sm:$0xff]  ;;  %v1772_v11 = vld [vmem:[%s2222_s2 + $0x320] sm:$0xff]  ;;  %v40_v14 = vperm.slane %v2136_v50, 6 }
  0x2e   :  { %1061 = vmatpush.bf16.msrb.mxu1 %v1708_v59  ;;  %v1783_v59 = vld [vmem:[%s2222_s2 + $0x378] sm:$0xff]  ;;  %v1769_v19 = vld [vmem:[%s2222_s2 + $0x308] sm:$0xff] }
  0x2f   :  { %1074 = vmatpush.bf16.msrb.mxu2 %v1716_v60  ;;  %v36_v60 = vperm.slane %v2136_v50, 2 }
  0x30   :  { %1087 = vmatpush.bf16.msrb.mxu3 %v1724_v61  ;;  %v885_v61 = vpack.c.b16 %v772_v51, %v772_v51 }
  0x31   :  { %1099 = vmatpush.bf16.msra.mxu0 %v1733_v62  ;;  %v1752_v62 = vld [vmem:[%s2222_s2 + $0x280] sm:$0xff] }
  0x32   :  { %1062 = vmatpush.bf16.msrb.mxu1 %v1707_v63  ;;  %v1761_v63 = vld [vmem:[%s2222_s2 + $0x2c8] sm:$0xff] }
  0x33   :  { %1075 = vmatpush.bf16.msrb.mxu2 %v1715_v0  ;;  %v64_v0 = vpack.c.bf16 %v34_v54, %v34_v54 }
  0x34   :  { %1088 = vmatpush.bf16.msrb.mxu3 %v1723_v1  ;;  %v65_v1 = vpack.c.bf16 %v35_v55, %v35_v55 }
  0x35   :  { %1100 = vmatpush.bf16.msra.mxu0 %v1732_v2  ;;  %v66_v2 = vpack.c.bf16 %v36_v60, %v36_v60 }
  0x36   :  { %1063 = vmatpush.bf16.msrb.mxu1 %v1706_v3  ;;  %v1774_v3 = vld [vmem:[%s2222_s2 + $0x330] sm:$0xff] }
  0x37   :  { %1076 = vmatpush.bf16.msrb.mxu2 %v1714_v4  ;;  %v37_v4 = vperm.slane %v2136_v50, 3 }
  0x38   :  { %1089 = vmatpush.bf16.msrb.mxu3 %v1722_v5  ;;  %v1004_v5 = vsel %vm1002_vm3, %v885_v61, 0 }
  0x39   :  { %1101 = vmatpush.bf16.msra.mxu0 %v1731_v6  ;;  %v1782_v6 = vld [vmem:[%s2222_s2 + $0x370] sm:$0xff] }
  0x3a   :  { %1064 = vmatpush.bf16.msrb.mxu1 %v1705_v7  ;;  %v1760_v7 = vld [vmem:[%s2222_s2 + $0x2c0] sm:$0xff] }
  0x3b   :  { %1077 = vmatpush.bf16.msrb.mxu2 %v1713_v8  ;;  %v1773_v8 = vld [vmem:[%s2222_s2 + $0x328] sm:$0xff] }
  0x3c   :  { %1090 = vmatpush.bf16.msrb.mxu3 %v1721_v9  ;;  %v67_v9 = vpack.c.bf16 %v37_v4, %v37_v4 }
  0x3d   :  { %1102 = vmatpush.bf16.msra.mxu0 %v1730_v10  ;;  %v1781_v10 = vld [vmem:[%s2222_s2 + $0x368] sm:$0xff] }
  0x3e   :  { %1065 = vmatpush.bf16.msrb.mxu1 %v1704_v12  ;;  %v1780_v12 = vld [vmem:[%s2222_s2 + $0x360] sm:$0xff] }
  0x3f   :  { %1078 = vmatpush.bf16.msrb.mxu2 %v1712_v13  ;;  %v1771_v13 = vld [vmem:[%s2222_s2 + $0x318] sm:$0xff] }
  0x40   :  { %1091 = vmatpush.bf16.msrb.mxu3 %v1720_v17  ;;  %v70_v17 = vpack.c.bf16 %v40_v14, %v40_v14 }
  0x41   :  { %1103 = vmatpush.bf16.msra.mxu0 %v1729_v18  ;;  %1066 = vmatmul.bf16.vlgmr.msrb.gmra.mxu1 %v60_v22  ;;  %v1778_v18 = vld [vmem:[%s2222_s2 + $0x350] sm:$0xff]  ;;  %v1768_v22 = vld [vmem:[%s2222_s2 + $0x300] sm:$0xff] }
  0x42   :  { %1110 = vmatpush.bf16.msra.mxu1 %v1743_v15  ;;  %1079 = vmatmul.bf16.vlgmr.msrb.gmra.mxu2 %v61_v21  ;;  %v1779_v15 = vld [vmem:[%s2222_s2 + $0x358] sm:$0xff]  ;;  %v38_v21 = vperm.slane %v2136_v50, 4 }
  0x43   :  { %1123 = vmatpush.bf16.msra.mxu2 %v1751_v16  ;;  %1092 = vmatmul.bf16.vlgmr.msrb.gmra.mxu3 %v62_v25  ;;  %v1770_v16 = vld [vmem:[%s2222_s2 + $0x310] sm:$0xff] }
  0x44   :  { %1136 = vmatpush.bf16.msra.mxu3 %v1759_v20  ;;  %v1777_v20 = vld [vmem:[%s2222_s2 + $0x348] sm:$0xff]  ;;  %v68_v25 = vpack.c.bf16 %v38_v21, %v38_v21 }
  0x45   :  { %1104 = vmatpush.bf16.msra.mxu0 %v1728_v26 }
  0x46   :  { %1111 = vmatpush.bf16.msra.mxu1 %v1742_v23  ;;  %v39_v23 = vperm.slane %v2136_v50, 5 }
  0x47   :  { %1124 = vmatpush.bf16.msra.mxu2 %v1750_v24  ;;  %v1776_v24 = vld [vmem:[%s2222_s2 + $0x340] sm:$0xff] }
  0x48   :  { %1137 = vmatpush.bf16.msra.mxu3 %v1758_v28  ;;  %1105 = vmatmul.bf16.vlgmr.msra.gmra.mxu0 %v63_v32  ;;  %v69_v26 = vpack.c.bf16 %v39_v23, %v39_v23 }
  0x49   :  { %1149 = vmatpush.bf16.msrb.mxu0 %v1767_v29 }
  0x4a   :  { %1112 = vmatpush.bf16.msra.mxu1 %v1741_v30 }
  0x4b   :  { %1125 = vmatpush.bf16.msra.mxu2 %v1749_v31 }
  0x4c   :  { %1138 = vmatpush.bf16.msra.mxu3 %v1757_v33 }
  0x4d   :  { %1150 = vmatpush.bf16.msrb.mxu0 %v1766_v34 }
  0x4e   :  { %1113 = vmatpush.bf16.msra.mxu1 %v1740_v35 }
  0x4f   :  { %1126 = vmatpush.bf16.msra.mxu2 %v1748_v36 }
  0x50   :  { %1139 = vmatpush.bf16.msra.mxu3 %v1756_v37 }
  0x51   :  { %1151 = vmatpush.bf16.msrb.mxu0 %v1765_v38 }
  0x52   :  { %1114 = vmatpush.bf16.msra.mxu1 %v1739_v39 }
  0x53   :  { %1127 = vmatpush.bf16.msra.mxu2 %v1747_v40 }
  0x54   :  { %1140 = vmatpush.bf16.msra.mxu3 %v1755_v41 }
  0x55   :  { %1152 = vmatpush.bf16.msrb.mxu0 %v1764_v42 }
  0x56   :  { %1115 = vmatpush.bf16.msra.mxu1 %v1738_v43 }
  0x57   :  { %1128 = vmatpush.bf16.msra.mxu2 %v1746_v44 }
  0x58   :  { %1141 = vmatpush.bf16.msra.mxu3 %v1754_v45 }
  0x59   :  { %1153 = vmatpush.bf16.msrb.mxu0 %v1763_v46 }
  0x5a   :  { %1116 = vmatpush.bf16.msra.mxu1 %v1737_v48 }
  0x5b   :  { %1129 = vmatpush.bf16.msra.mxu2 %v1745_v49 }
  0x5c   :  { %1142 = vmatpush.bf16.msra.mxu3 %v1753_v52 }
  0x5d   :  { %1154 = vmatpush.bf16.msrb.mxu0 %v1762_v53 }
  0x5e   :  { %1117 = vmatpush.bf16.msra.mxu1 %v1736_v56 }
  0x5f   :  { %1130 = vmatpush.bf16.msra.mxu2 %v1744_v57 }
  0x60   :  { %1143 = vmatpush.bf16.msra.mxu3 %v1752_v62 }
  0x61   :  { %1155 = vmatpush.bf16.msrb.mxu0 %v1761_v63  ;;  %1118 = vmatmul.bf16.vlgmr.msra.gmra.mxu1 %v64_v0 }
  0x62   :  { %1162 = vmatpush.bf16.msrb.mxu1 %v1775_v58  ;;  %1131 = vmatmul.bf16.vlgmr.msra.gmra.mxu2 %v65_v1 }
  0x63   :  { %1175 = vmatpush.bf16.msrb.mxu2 %v1783_v59  ;;  %1144 = vmatmul.bf16.vlgmr.msra.gmra.mxu3 %v66_v2 }
  0x64   :  { %1195 = vmatpush.bf16.msrb.mxu3 %v1004_v5 }
  0x65   :  { %1156 = vmatpush.bf16.msrb.mxu0 %v1760_v7 }
  0x66   :  { %1163 = vmatpush.bf16.msrb.mxu1 %v1774_v3 }
  0x67   :  { %1176 = vmatpush.bf16.msrb.mxu2 %v1782_v6 }
  0x68   :  { %1157 = vmatmul.bf16.vlgmr.msrb.gmra.mxu0 %v67_v9 }
  0x6a   :  { %1164 = vmatpush.bf16.msrb.mxu1 %v1773_v8  ;;  %v1201_v8 = vld [vmem:[%s2224_s4] sm:$0x1] }
  0x6b   :  { %1177 = vmatpush.bf16.msrb.mxu2 %v1781_v10 }
  0x6e   :  { %1165 = vmatpush.bf16.msrb.mxu1 %v1772_v11 }
  0x6f   :  { %1178 = vmatpush.bf16.msrb.mxu2 %v1780_v12 }
  0x72   :  { %1166 = vmatpush.bf16.msrb.mxu1 %v1771_v13 }
  0x73   :  { %1179 = vmatpush.bf16.msrb.mxu2 %v1779_v15  ;;  %1671 = vmatmul.msk.bf16.vlgmr.msrb.gmra.mxu3 %vm998_vm4, %v70_v17 }
  0x76   :  { %1167 = vmatpush.bf16.msrb.mxu1 %v1770_v16 }
  0x77   :  { %1180 = vmatpush.bf16.msrb.mxu2 %v1778_v18 }
  0x7a   :  { %1168 = vmatpush.bf16.msrb.mxu1 %v1769_v19 }
  0x7b   :  { %1181 = vmatpush.bf16.msrb.mxu2 %v1777_v20 }
  0x7e   :  { %1169 = vmatpush.bf16.msrb.mxu1 %v1768_v22 }
  0x7f   :  { %1182 = vmatpush.bf16.msrb.mxu2 %v1776_v24 }
  0x81   :  { %1170 = vmatmul.bf16.vlgmr.msrb.gmra.mxu1 %v68_v25 }
  0x82   :  { %1183 = vmatmul.bf16.vlgmr.msrb.gmra.mxu2 %v69_v26 }
  0x88   :  { %v319_v27 = vpop.f32.mrf.mxu0 }
  0x90   :  { %v321_v28 = vpop.f32.mrf.mxu0 }
  0x9e   :  { %v1015_v29 = vpop.f32.mrf.mxu1 }
  0x9f   :  { %v1016_v30 = vadd.f32 %v1015_v29, %v319_v27 }
  0xa5   :  { %v1028_v31 = vpop.f32.mrf.mxu2  ;;  %v1054_v33 = vpop.f32.mrf.mxu0 }
  0xa6   :  { %v1029_v32 = vadd.f32 %v1028_v31, %v1016_v30  ;;  %v1041_v34 = vpop.f32.mrf.mxu3  ;;  %v1017_v35 = vpop.f32.mrf.mxu1 }
  0xa8   :  { %v1042_v36 = vadd.f32 %v1041_v34, %v1029_v32 }
  0xaa   :  { %v1055_v37 = vadd.f32 %v1054_v33, %v1042_v36 }
  0xad   :  { %v1030_v38 = vpop.f32.mrf.mxu2  ;;  %v1056_v39 = vpop.f32.mrf.mxu0 }
  0xae   :  { %v1043_v40 = vpop.f32.mrf.mxu3 }
  0xbe   :  { %v1067_v41 = vpop.f32.mrf.mxu1 }
  0xbf   :  { %v1068_v54 = vadd.f32 %v1067_v41, %v1055_v37 }
  0xc5   :  { %v1080_v42 = vpop.f32.mrf.mxu2  ;;  %v1106_v43 = vpop.f32.mrf.mxu0 }
  0xc6   :  { %v1093_v44 = vpop.f32.mrf.mxu3  ;;  %v1069_v45 = vpop.f32.mrf.mxu1  ;;  %v1081_v55 = vadd.f32 %v1080_v42, %v1068_v54 }
  0xc8   :  { %v1094_v59 = vadd.f32 %v1093_v44, %v1081_v55 }
  0xca   :  { %v1107_v60 = vadd.f32 %v1106_v43, %v1094_v59 }
  0xcd   :  { %v1082_v46 = vpop.f32.mrf.mxu2  ;;  %v1108_v47 = vpop.f32.mrf.mxu0 }
  0xce   :  { %v1095_v48 = vpop.f32.mrf.mxu3 }
  0xde   :  { %v1119_v49 = vpop.f32.mrf.mxu1 }
  0xdf   :  { %v1120_v61 = vadd.f32 %v1119_v49, %v1107_v60 }
  0xe5   :  { %v1132_v50 = vpop.f32.mrf.mxu2  ;;  %v1158_v51 = vpop.f32.mrf.mxu0 }
  0xe6   :  { %v1145_v52 = vpop.f32.mrf.mxu3  ;;  %v1121_v53 = vpop.f32.mrf.mxu1  ;;  %v1133_v63 = vadd.f32 %v1132_v50, %v1120_v61 }
  0xe8   :  { %v1146_v0 = vadd.f32 %v1145_v52, %v1133_v63 }
  0xea   :  { %v1159_v3 = vadd.f32 %v1158_v51, %v1146_v0 }
  0xed   :  { %v1134_v56 = vpop.f32.mrf.mxu2  ;;  %v1160_v57 = vpop.f32.mrf.mxu0 }
  0xee   :  { %v1147_v58 = vpop.f32.mrf.mxu3 }
  0xf6   :  { %v1197_v62 = vpop.f32.mrf.mxu3 }
  0xfe   :  { %v1171_v1 = vpop.f32.mrf.mxu1  ;;  %v1199_v2 = vpop.f32.mrf.mxu3 }
  0xff   :  { %v1172_v4 = vadd.f32 %v1171_v1, %v1159_v3 }
 0x105   :  { %v1184_v5 = vpop.f32.mrf.mxu2 }
 0x106   :  { %v1185_v6 = vadd.f32 %v1184_v5, %v1172_v4  ;;  %v1173_v7 = vpop.f32.mrf.mxu1 }
 0x108   :  { %v1198_v9 = vadd.f32 %v1197_v62, %v1185_v6 }
 0x10a   :  { %v1202_v10 = vadd.f32 %v1201_v8, %v1198_v9 }
 0x10c   :  { %v1203_v11 = vmax.f32 %v1202_v10, 0.0 }
 0x10d   :  { %v1186_v12 = vpop.f32.mrf.mxu2 }
 0x10e   :  { %1205 = vst.msk [vmem:[#allocation2] sm:$0x1] %vm1204_vm5, %v1203_v11 }
 0x10f   :  { %1216 = dma.vmem_to_hbm [thread:$0]  %s1212_s11, 16, %s1214_s13, [#allocation3]  }
 0x110   :  { %1810 = dma.done.wait [#allocation3], 16  }
 0x111   :  { %1811 = vsyncadd [#allocation3], 4294967280 }
 0x112   :  { %1221 = vsyncpa [#allocation3], 1 }

</bundles_post_ra>
